<compile_context>
chip_gen: v7x
topology: tpu7x:2x2x1
jax: 0.10.0
libtpu: 0.0.40
codegen_flags: <defaults>
</compile_context>

<pallas_src>
import functools

import jax
import jax.numpy as jnp
from jax.experimental import pallas as pl
from jax.experimental.pallas import tpu as pltpu


# Budget for the double-buffered input blocks of one grid step:
#   2 inputs x 2 pipeline buffers x (block_n * tile_d) * itemsize  <=  this.
# 8 MiB stays comfortably under the scoped-VMEM defaults of every generation
# (v5e 16 MiB, v6e/v7x 32 MiB) and far under v7x's 64 MiB physical VMEM.
_BLOCK_BYTE_BUDGET = 8 * 1024 * 1024


def _cosine_partial_kernel(pred_ref, targ_ref, cos_ref,
                           acc_dot, acc_pp, acc_tt, *, eps):
    """Grid = (batch blocks ["parallel"], D tiles ["arbitrary"]).

    Emits the per-sample cosine similarity for this batch block."""
    k = pl.program_id(1)

    @pl.when(k == 0)
    def _():
        acc_dot[...] = jnp.zeros_like(acc_dot)
        acc_pp[...] = jnp.zeros_like(acc_pp)
        acc_tt[...] = jnp.zeros_like(acc_tt)

    p = pred_ref[...].astype(jnp.float32)
    t = targ_ref[...].astype(jnp.float32)
    # Per-step cross-lane partial reduce (XLU slot, fully hidden under DMA in a
    # mem-bound kernel) keeps accumulators at (block_n, 1) so tile_d can be wide.
    acc_dot[...] += jnp.sum(p * t, axis=1, keepdims=True)
    acc_pp[...] += jnp.sum(p * p, axis=1, keepdims=True)
    acc_tt[...] += jnp.sum(t * t, axis=1, keepdims=True)

    @pl.when(k == pl.num_programs(1) - 1)
    def _():
        # cos = dot / max(||p|| * ||t||, eps), via a single EUP rsqrt.
        denom_sq = jnp.maximum(acc_pp[...] * acc_tt[...], eps * eps)
        cos_ref[...] = acc_dot[...] * jax.lax.rsqrt(denom_sq)


def _choose_blocks(n, d, itemsize, max_block_bytes):
    """Pick (block_n, tile_d, d_eff) at trace time.

    block_n: multiple of the sublane packing (8/16/32 for 4/2/1-byte dtypes)
             dividing N, else full N.
    tile_d : multiple of 128 dividing d_eff, sized to the VMEM block budget,
             or full D when the whole row fits (single D block, no accumulation
             phases needed beyond one pass).
    d_eff  : D, or D zero-padded up to a wide lane tile for awkward shapes.
    """
    sub = {4: 8, 2: 16, 1: 32}.get(itemsize, 8)

    block_n = n
    if n % sub == 0:
        for cand in (64, 32, 16, 8):          # enables the "parallel" batch axis
            if cand % sub == 0 and n % cand == 0 and cand < n:
                block_n = cand
                break

    per_buf_bytes = max(max_block_bytes // 4, 128 * itemsize)
    cap = max(128, (per_buf_bytes // (block_n * itemsize)) // 128 * 128)

    if d <= cap:
        # Whole feature dim in one block (full dim => no 128-divisibility rule).
        return block_n, d, d

    tile = 0
    if d % 128 == 0:
        for m in range(cap // 128, 0, -1):    # largest 128-multiple divisor of D
            if d % (128 * m) == 0:
                tile = 128 * m
                break
    if tile >= 512:
        return block_n, tile, d

    # Awkward D (not a multiple of 128, or only a narrow divisor available):
    # zero-pad up to a wide lane tile.  Zeros do not change dot/||.||^2 sums.
    tile = min(cap, 2048)
    d_eff = ((d + tile - 1) // tile) * tile
    return block_n, tile, d_eff


def loss_torchmetrics_cosine(pred, target, *, weight=1.0, eps=1e-8,
                             max_block_bytes=_BLOCK_BYTE_BUDGET):
    """Equivalent of _LossTorchMetrics(CosineSimilarity(reduction='mean')).forward.

    Returns the scalar stored under losses[fn_name]:  weight * (1 - mean cos)."""
    n = pred.shape[0]
    p2 = pred.reshape(n, -1)                  # input_preprocessing_fn: flatten
    t2 = target.reshape(n, -1)
    assert p2.shape == t2.shape
    d = p2.shape[1]
    itemsize = jnp.dtype(p2.dtype).itemsize

    block_n, tile_d, d_eff = _choose_blocks(n, d, itemsize, max_block_bytes)
    if d_eff != d:
        pad = d_eff - d
        p2 = jnp.pad(p2, ((0, 0), (0, pad)))
        t2 = jnp.pad(t2, ((0, 0), (0, pad)))

    grid = (n // block_n, d_eff // tile_d)
    kernel = functools.partial(_cosine_partial_kernel, eps=float(eps))

    cos = pl.pallas_call(
        kernel,
        out_shape=jax.ShapeDtypeStruct((n, 1), jnp.float32),
        grid_spec=pltpu.PrefetchScalarGridSpec(
            num_scalar_prefetch=0,
            grid=grid,
            in_specs=[
                pl.BlockSpec((block_n, tile_d), lambda i, k: (i, k)),
                pl.BlockSpec((block_n, tile_d), lambda i, k: (i, k)),
            ],
            out_specs=pl.BlockSpec((block_n, 1), lambda i, k: (i, 0)),
            scratch_shapes=[
                pltpu.VMEM((block_n, 1), jnp.float32),   # acc_dot
                pltpu.VMEM((block_n, 1), jnp.float32),   # acc_pp
                pltpu.VMEM((block_n, 1), jnp.float32),   # acc_tt
            ],
        ),
        compiler_params=pltpu.CompilerParams(
            dimension_semantics=("parallel", "arbitrary")),
        cost_estimate=pl.CostEstimate(
            flops=6 * n * d_eff,
            transcendentals=n,
            bytes_accessed=2 * n * d_eff * itemsize + n * 4),
    )(p2, t2)

    # loss_postprocessing_fn (1 - x), reduction="mean", and weight: a tiny scalar
    # epilogue over N values, left to XLA so the batch grid axis can stay
    # "parallel" (megacore on v7x).
    return weight * (1.0 - jnp.mean(cos))


def loss_combine(loss_fns, batch, model_output, **kwargs):
    """LossCombine.forward: run every loss module and prefix its outputs."""
    metrics_all, losses_all = {}, {}
    for loss_name, loss_fn in loss_fns.items():
        metrics, losses = loss_fn(batch, model_output, **kwargs)
        for m_name, m in metrics.items():
            metrics_all[f"{loss_name}_{m_name}" if m_name else loss_name] = m
        for l_name, l in losses.items():
            losses_all[f"{loss_name}_{l_name}" if l_name else loss_name] = l
    return metrics_all, losses_all


def _reference(pred_nchw, target_nchw, weight=1.0):
    n = pred_nchw.shape[0]
    p = pred_nchw.reshape(n, -1).astype(jnp.float32)
    t = target_nchw.reshape(n, -1).astype(jnp.float32)
    cos = jnp.sum(p * t, axis=1) / (
        jnp.linalg.norm(p, axis=1) * jnp.linalg.norm(t, axis=1))
    return weight * (1.0 - jnp.mean(cos))


if __name__ == "__main__":
    key = jax.random.PRNGKey(0)
    k1, k2, k3, k4 = jax.random.split(key, 4)

    # model_output and batch[batch_key] — small NCHW images
    model_output = jax.random.normal(k1, (2, 4, 16, 16), dtype=jnp.float32)
    target = jax.random.normal(k2, (2, 4, 16, 16), dtype=jnp.float32)

    # 1) Default path (single (N, D) block, grid (1, 1)) through LossCombine.
    def _cosine_loss_module(batch, out):
        l = loss_torchmetrics_cosine(out, batch, weight=1.0)
        return {}, {"": l}

    _, losses = loss_combine({"cosine": _cosine_loss_module}, target, model_output)
    loss = jax.block_until_ready(losses["cosine"])
    ref = _reference(model_output, target, weight=1.0)
    assert jnp.allclose(loss, ref, atol=1e-5, rtol=1e-5), (loss, ref)

    # 2) Tiled-D accumulation path (force a tiny VMEM block budget) + weight.
    loss_t = jax.block_until_ready(
        loss_torchmetrics_cosine(model_output, target, weight=2.0,
                                 max_block_bytes=8192))
    ref_t = _reference(model_output, target, weight=2.0)
    assert jnp.allclose(loss_t, ref_t, atol=1e-5, rtol=1e-5), (loss_t, ref_t)

    # 3) Batch-blocked "parallel" axis path (N multiple of 8 -> 2 batch blocks).
    mo3 = jax.random.normal(k3, (16, 4, 8, 8), dtype=jnp.float32)
    tg3 = jax.random.normal(k4, (16, 4, 8, 8), dtype=jnp.float32)
    loss_b = jax.block_until_ready(loss_torchmetrics_cosine(mo3, tg3))
    ref_b = _reference(mo3, tg3)
    assert jnp.allclose(loss_b, ref_b, atol=1e-5, rtol=1e-5), (loss_b, ref_b)

    # 4) bf16 streaming (half the HBM bytes), f32 accumulation inside the kernel.
    loss_bf = jax.block_until_ready(
        loss_torchmetrics_cosine(model_output.astype(jnp.bfloat16),
                                 target.astype(jnp.bfloat16)))
    ref_bf = _reference(model_output.astype(jnp.bfloat16),
                        target.astype(jnp.bfloat16))
    assert jnp.allclose(loss_bf, ref_bf, atol=1e-4, rtol=1e-4), (loss_bf, ref_bf)

    # TODO(synk): metric_fn is a generic torchmetrics factory; only the
    # CosineSimilarity(reduction="mean") instantiation is implemented as a kernel.
    print("KERNEL_OK")
</pallas_src>

<mosaic_0001>
module attributes {stable_mosaic.version = 11 : i64} {
  func.func @_cosine_partial_kernel(%arg0: i32, %arg1: i32, %arg2: memref<2x1024xf32, #tpu.memory_space<vmem>>, %arg3: memref<2x1024xf32, #tpu.memory_space<vmem>>, %arg4: memref<2x1xf32, #tpu.memory_space<vmem>>, %arg5: memref<2x1xf32, #tpu.memory_space<vmem>>, %arg6: memref<2x1xf32, #tpu.memory_space<vmem>>, %arg7: memref<2x1xf32, #tpu.memory_space<vmem>>) attributes {dimension_semantics = [#tpu.dimension_semantics<parallel>, #tpu.dimension_semantics<arbitrary>], iteration_bounds = array<i64: 1, 1>, scalar_prefetch = 0 : i64, scratch_operands = 3 : i64, tpu.core_type = #tpu.core_type<tc>, window_params = [{transform_indices = @transform_0, window_bounds = array<i64: 2, 1024>}, {transform_indices = @transform_1, window_bounds = array<i64: 2, 1024>}, {transform_indices = @transform_2, window_bounds = array<i64: 2, 1>}]} {
    %c0_i32 = arith.constant 0 : i32
    %0 = arith.cmpi eq, %arg1, %c0_i32 : i32
    %1 = arith.extui %0 : i1 to i32
    %c0_i32_0 = arith.constant 0 : i32
    %2 = arith.cmpi ne, %1, %c0_i32_0 : i32
    scf.if %2 {
      %cst_20 = arith.constant 0.000000e+00 : f32
      %26 = vector.broadcast %cst_20 : f32 to vector<2x1xf32>
      %c0_21 = arith.constant 0 : index
      %c0_22 = arith.constant 0 : index
      %27 = vector.load %arg5[%c0_21, %c0_22] : memref<2x1xf32, #tpu.memory_space<vmem>>, vector<2x1xf32>
      tpu.vector_store %arg5[%c0_21, %c0_22], %26 {strides = array<i32>} : memref<2x1xf32, #tpu.memory_space<vmem>>, vector<2x1xf32>,
      %cst_23 = arith.constant 0.000000e+00 : f32
      %28 = vector.broadcast %cst_23 : f32 to vector<2x1xf32>
      %c0_24 = arith.constant 0 : index
      %c0_25 = arith.constant 0 : index
      %29 = vector.load %arg6[%c0_24, %c0_25] : memref<2x1xf32, #tpu.memory_space<vmem>>, vector<2x1xf32>
      tpu.vector_store %arg6[%c0_24, %c0_25], %28 {strides = array<i32>} : memref<2x1xf32, #tpu.memory_space<vmem>>, vector<2x1xf32>,
      %cst_26 = arith.constant 0.000000e+00 : f32
      %30 = vector.broadcast %cst_26 : f32 to vector<2x1xf32>
      %c0_27 = arith.constant 0 : index
      %c0_28 = arith.constant 0 : index
      %31 = vector.load %arg7[%c0_27, %c0_28] : memref<2x1xf32, #tpu.memory_space<vmem>>, vector<2x1xf32>
      tpu.vector_store %arg7[%c0_27, %c0_28], %30 {strides = array<i32>} : memref<2x1xf32, #tpu.memory_space<vmem>>, vector<2x1xf32>,
    } else {
    }
    %c0 = arith.constant 0 : index
    %c0_1 = arith.constant 0 : index
    %3 = vector.load %arg2[%c0, %c0_1] : memref<2x1024xf32, #tpu.memory_space<vmem>>, vector<2x1024xf32>
    %c0_2 = arith.constant 0 : index
    %c0_3 = arith.constant 0 : index
    %4 = vector.load %arg3[%c0_2, %c0_3] : memref<2x1024xf32, #tpu.memory_space<vmem>>, vector<2x1024xf32>
    %c0_4 = arith.constant 0 : index
    %c0_5 = arith.constant 0 : index
    %5 = vector.load %arg5[%c0_4, %c0_5] : memref<2x1xf32, #tpu.memory_space<vmem>>, vector<2x1xf32>
    %6 = arith.mulf %3, %4 : vector<2x1024xf32>
    %cst = arith.constant dense<0.000000e+00> : vector<2xf32>
    %7 = vector.multi_reduction <add>, %6, %cst [1] : vector<2x1024xf32> to vector<2xf32>
    %8 = vector.shape_cast %7 : vector<2xf32> to vector<2x1xf32>
    %9 = arith.addf %5, %8 : vector<2x1xf32>
    %c0_6 = arith.constant 0 : index
    %c0_7 = arith.constant 0 : index
    %10 = vector.load %arg5[%c0_6, %c0_7] : memref<2x1xf32, #tpu.memory_space<vmem>>, vector<2x1xf32>
    tpu.vector_store %arg5[%c0_6, %c0_7], %9 {strides = array<i32>} : memref<2x1xf32, #tpu.memory_space<vmem>>, vector<2x1xf32>,
    %c0_8 = arith.constant 0 : index
    %c0_9 = arith.constant 0 : index
    %11 = vector.load %arg6[%c0_8, %c0_9] : memref<2x1xf32, #tpu.memory_space<vmem>>, vector<2x1xf32>
    %12 = arith.mulf %3, %3 : vector<2x1024xf32>
    %cst_10 = arith.constant dense<0.000000e+00> : vector<2xf32>
    %13 = vector.multi_reduction <add>, %12, %cst_10 [1] : vector<2x1024xf32> to vector<2xf32>
    %14 = vector.shape_cast %13 : vector<2xf32> to vector<2x1xf32>
    %15 = arith.addf %11, %14 : vector<2x1xf32>
    %c0_11 = arith.constant 0 : index
    %c0_12 = arith.constant 0 : index
    %16 = vector.load %arg6[%c0_11, %c0_12] : memref<2x1xf32, #tpu.memory_space<vmem>>, vector<2x1xf32>
    tpu.vector_store %arg6[%c0_11, %c0_12], %15 {strides = array<i32>} : memref<2x1xf32, #tpu.memory_space<vmem>>, vector<2x1xf32>,
    %c0_13 = arith.constant 0 : index
    %c0_14 = arith.constant 0 : index
    %17 = vector.load %arg7[%c0_13, %c0_14] : memref<2x1xf32, #tpu.memory_space<vmem>>, vector<2x1xf32>
    %18 = arith.mulf %4, %4 : vector<2x1024xf32>
    %cst_15 = arith.constant dense<0.000000e+00> : vector<2xf32>
    %19 = vector.multi_reduction <add>, %18, %cst_15 [1] : vector<2x1024xf32> to vector<2xf32>
    %20 = vector.shape_cast %19 : vector<2xf32> to vector<2x1xf32>
    %21 = arith.addf %17, %20 : vector<2x1xf32>
    %c0_16 = arith.constant 0 : index
    %c0_17 = arith.constant 0 : index
    %22 = vector.load %arg7[%c0_16, %c0_17] : memref<2x1xf32, #tpu.memory_space<vmem>>, vector<2x1xf32>
    tpu.vector_store %arg7[%c0_16, %c0_17], %21 {strides = array<i32>} : memref<2x1xf32, #tpu.memory_space<vmem>>, vector<2x1xf32>,
    %c0_i32_18 = arith.constant 0 : i32
    %23 = arith.cmpi eq, %arg1, %c0_i32_18 : i32
    %24 = arith.extui %23 : i1 to i32
    %c0_i32_19 = arith.constant 0 : i32
    %25 = arith.cmpi ne, %24, %c0_i32_19 : i32
    scf.if %25 {
      %c0_20 = arith.constant 0 : index
      %c0_21 = arith.constant 0 : index
      %26 = vector.load %arg6[%c0_20, %c0_21] : memref<2x1xf32, #tpu.memory_space<vmem>>, vector<2x1xf32>
      %c0_22 = arith.constant 0 : index
      %c0_23 = arith.constant 0 : index
      %27 = vector.load %arg7[%c0_22, %c0_23] : memref<2x1xf32, #tpu.memory_space<vmem>>, vector<2x1xf32>
      %28 = arith.mulf %26, %27 : vector<2x1xf32>
      %cst_24 = arith.constant 1.000000e-16 : f32
      %29 = vector.broadcast %cst_24 : f32 to vector<2x1xf32>
      %30 = arith.maximumf %28, %29 : vector<2x1xf32>
      %c0_25 = arith.constant 0 : index
      %c0_26 = arith.constant 0 : index
      %31 = vector.load %arg5[%c0_25, %c0_26] : memref<2x1xf32, #tpu.memory_space<vmem>>, vector<2x1xf32>
      %32 = math.rsqrt %30 : vector<2x1xf32>
      %33 = arith.mulf %31, %32 : vector<2x1xf32>
      %c0_27 = arith.constant 0 : index
      %c0_28 = arith.constant 0 : index
      %34 = vector.load %arg4[%c0_27, %c0_28] : memref<2x1xf32, #tpu.memory_space<vmem>>, vector<2x1xf32>
      tpu.vector_store %arg4[%c0_27, %c0_28], %33 {strides = array<i32>} : memref<2x1xf32, #tpu.memory_space<vmem>>, vector<2x1xf32>,
    } else {
    }
    return
  }
  func.func @transform_0(%arg0: i32, %arg1: i32) -> (i32, i32) {
    %c0_i32 = arith.constant 0 : i32
    return %arg0, %arg1 : i32, i32
  }
  func.func @transform_1(%arg0: i32, %arg1: i32) -> (i32, i32) {
    %c0_i32 = arith.constant 0 : i32
    return %arg0, %arg1 : i32, i32
  }
  func.func @transform_2(%arg0: i32, %arg1: i32) -> (i32, i32) {
    %c0_i32 = arith.constant 0 : i32
    %c0_i32_0 = arith.constant 0 : i32
    return %arg0, %c0_i32 : i32, i32
  }
}

</mosaic_0001>

<bundles_post_ra>
// kernel: tpu_custom_call.1
= control target key start
LH: loop header
LB: loop body
LE: loop exit
PB: predicated region body
PF: predicated region fallthrough
CT: control target
= control target key end

     0   :  { %7 = vsyncpa [#allocation6], 0  ;;  %s409_s0 = inlined_call_operand.hbm [shape: f32[2,1024], index: 0, kind: input, shape index: {}]   ;;  %s410_s1 = inlined_call_operand.hbm [shape: f32[2,1024], index: 1, kind: input, shape index: {}]   ;;  %s411_s2 = inlined_call_operand.vmem [shape: f32[2,1], index: 2, kind: output, shape index: {}]  }
   0x1   :  { %8 = vsyncpa [#allocation8], 0  ;;  %s318_s9 = smov [#allocation5]   ;;  %s319_s11 = smov [#allocation7]  }
   0x2   :  { %s15_s10 = sshll.u32 %s318_s9, 4  ;;  %s25_s12 = sshll.u32 %s319_s11, 4  ;;  %s16_s10 = int_to_ptr.vmem [resolvable:$true] %s15_s10  ;;  %s26_s12 = int_to_ptr.vmem [resolvable:$true] %s25_s12 }
   0x3   :  { %s270_s15 = scalar_lea.hbm %s409_s0, 256 }
   0x4   :  { %p271_p0 = scmp.ne.s32.totalorder %s409_s0, %s270_s15  ;;  %p274_p1 = scmp.lt.u32.totalorder %s270_s15, %s409_s0 }
   0x6   :  { %p276_p2 = pnand %p274_p1, %p271_p0 }
   0x8   :  { %279 = shalt.err (!%p276_p2)
}
   0x9   :  { %s280_s20 = scalar_lea.vmem %s16_s10, 256  ;;  %p285_p4 = scmp.lt.s32.totalorder %s16_s10, %s16_s10 }
   0xa   :  { %p281_p3 = scmp.ne.s32.totalorder %s16_s10, %s280_s20  ;;  %p286_p5 = scmp.lt.s32.totalorder %s280_s20, %s280_s20 }
   0xc   :  { %p287_p6 = por %p286_p5, %p285_p4 }
   0xe   :  { %p288_p7 = pnand %p287_p6, %p281_p3 }
  0x10   :  { %291 = shalt.err (!%p288_p7)
}
  0x11   :  { %18 = dma.hbm_to_vmem [thread:$0]  %s409_s0, 256, %s16_s10, [#allocation6]  }
  0x12   :  { %s292_s25 = scalar_lea.hbm %s410_s1, 256 }
  0x13   :  { %p293_p8 = scmp.ne.s32.totalorder %s410_s1, %s292_s25  ;;  %p296_p9 = scmp.lt.u32.totalorder %s292_s25, %s410_s1 }
  0x15   :  { %p298_p10 = pnand %p296_p9, %p293_p8 }
  0x17   :  { %301 = shalt.err (!%p298_p10)
}
  0x18   :  { %s302_s30 = scalar_lea.vmem %s26_s12, 256  ;;  %p307_p12 = scmp.lt.s32.totalorder %s26_s12, %s26_s12 }
  0x19   :  { %p303_p11 = scmp.ne.s32.totalorder %s26_s12, %s302_s30  ;;  %p308_p13 = scmp.lt.s32.totalorder %s302_s30, %s302_s30 }
  0x1b   :  { %p309_p0 = por %p308_p13, %p307_p12 }
  0x1d   :  { %p310_p1 = pnand %p309_p0, %p303_p11 }
  0x1f   :  { %313 = shalt.err (!%p310_p1)
}
  0x20   :  { %28 = dma.hbm_to_vmem [thread:$0]  %s410_s1, 256, %s26_s12, [#allocation8]  }
  0x21   :  { %314 = dma.done.wait [#allocation6], 256  }
  0x22   :  { %315 = vsyncadd [#allocation6], 4294967040 }
  0x23   :  { %316 = dma.done.wait [#allocation8], 256  }
  0x24   :  { %317 = vsyncadd [#allocation8], 4294967040  ;;  %v56_v0 = vlaneseq  ;;  %vm39_vm0 = vcmask 1024   ;;  %v320_v1 = vmov 1983009808   ;;  %v321_v4 = vmov 0.0  }
  0x25   :  { %v54_v2 = vunpack.c.l.s4 %v320_v1  ;;  %41 = vst.msk [vmem:[#allocation3] sm:$0x3] %vm39_vm0, %v321_v4  ;;  %40 = vst.msk [vmem:[#allocation2] sm:$0x3] %vm39_vm0, %v321_v4  ;;  %v43_v7 = vld [vmem:[#allocation5] sm:$0xff]  ;;  %v44_v8 = vld [vmem:[#allocation5 + $0x8] sm:$0xff] }
  0x26   :  { %v57_v3 = vshrl.u32 %v56_v0, 7  ;;  %42 = vst.msk [vmem:[#allocation4] sm:$0x3] %vm39_vm0, %v321_v4  ;;  %v45_v9 = vld [vmem:[#allocation7] sm:$0xff]  ;;  %v116_v10 = vmul.f32 %v43_v7, %v43_v7  ;;  %v117_v11 = vmul.f32 %v44_v8, %v44_v8  ;;  %v46_v12 = vld [vmem:[#allocation7 + $0x8] sm:$0xff]  ;;  %vm94_vm1 = vcmask 1041408  }
  0x27   :  { %v55_v5 = vunpack.c.0.s8 %v54_v2  ;;  %v182_v13 = vmul.f32 %v45_v9, %v45_v9  ;;  %v183_v17 = vmul.f32 %v46_v12, %v46_v12  ;;  %v48_v36 = vmul.f32 %v45_v9, %v43_v7 }
  0x28   :  { %v120_v14 = vcombine.high %v116_v10, %v116_v10  ;;  %v137_v16 = vcombine.high %v117_v11, %v117_v11  ;;  %v49_v37 = vmul.f32 %v46_v12, %v44_v8 }
  0x29   :  { %v364_v6 = vsub.s32 %v55_v5, %v57_v3  ;;  %v186_v18 = vcombine.high %v182_v13, %v182_v13  ;;  %v203_v26 = vcombine.high %v183_v17, %v183_v17  ;;  %v52_v49 = vcombine.high %v48_v36, %v48_v36 }
  0x2a   :  { %v69_v57 = vcombine.high %v49_v37, %v49_v37 }
  0x2b   :  { %v127_v15 = vrot.slane %v116_v10, %v364_v6  ;;  %v193_v19 = vrot.slane %v182_v13, %v364_v6  ;;  %v134_v20 = vrot.slane %v120_v14, %v364_v6  ;;  %v144_v22 = vrot.slane %v117_v11, %v364_v6 }
  0x2c   :  { %v200_v24 = vrot.slane %v186_v18, %v364_v6  ;;  %v151_v28 = vrot.slane %v137_v16, %v364_v6  ;;  %v210_v33 = vrot.slane %v183_v17, %v364_v6  ;;  %v217_v44 = vrot.slane %v203_v26, %v364_v6 }
  0x2d   :  { %v135_v21 = vcombine.high %v127_v15, %v127_v15  ;;  %v162_v23 = vsel %vm94_vm1, %v127_v15, 0.0  ;;  %v201_v25 = vcombine.high %v193_v19, %v193_v19  ;;  %v136_v27 = vcombine.high %v134_v20, %v134_v20 }
  0x2e   :  { %v165_v30 = vsel %vm94_vm1, %v134_v20, 0.0  ;;  %v202_v32 = vcombine.high %v200_v24, %v200_v24  ;;  %v152_v34 = vcombine.high %v144_v22, %v144_v22  ;;  %v228_v39 = vsel %vm94_vm1, %v193_v19, 0.0 }
  0x2f   :  { %v163_v29 = vsel %vm94_vm1, %v135_v21, 0.0  ;;  %v167_v35 = vsel %vm94_vm1, %v136_v27, 0.0  ;;  %v229_v40 = vsel %vm94_vm1, %v201_v25, 0.0  ;;  %v231_v41 = vsel %vm94_vm1, %v200_v24, 0.0 }
  0x30   :  { %v164_v31 = vadd.f32 %v163_v29, %v162_v23  ;;  %v153_v42 = vcombine.high %v151_v28, %v151_v28  ;;  %v169_v43 = vsel %vm94_vm1, %v144_v22, 0.0  ;;  %v230_v45 = vadd.f32 %v229_v40, %v228_v39 }
  0x31   :  { %v218_v47 = vcombine.high %v210_v33, %v210_v33  ;;  %v233_v48 = vsel %vm94_vm1, %v202_v32, 0.0  ;;  %v171_v50 = vsel %vm94_vm1, %v152_v34, 0.0  ;;  %v173_v51 = vsel %vm94_vm1, %v151_v28, 0.0  ;;  %v115_v28 = vld [vmem:[#allocation3] sm:$0x3] }
  0x32   :  { %v166_v38 = vadd.f32 %v165_v30, %v164_v31  ;;  %v232_v52 = vadd.f32 %v231_v41, %v230_v45  ;;  %v59_v53 = vrot.slane %v48_v36, %v364_v6  ;;  %v235_v55 = vsel %vm94_vm1, %v210_v33, 0.0  ;;  %v181_v31 = vld [vmem:[#allocation4] sm:$0x3]  ;;  %v47_v34 = vld [vmem:[#allocation2] sm:$0x3] }
  0x33   :  { %v66_v56 = vrot.slane %v52_v49, %v364_v6  ;;  %v76_v60 = vrot.slane %v49_v37, %v364_v6  ;;  %v219_v63 = vcombine.high %v217_v44, %v217_v44  ;;  %v237_v0 = vsel %vm94_vm1, %v218_v47, 0.0 }
  0x34   :  { %v168_v46 = vadd.f32 %v167_v35, %v166_v38  ;;  %v234_v58 = vadd.f32 %v233_v48, %v232_v52  ;;  %v67_v59 = vcombine.high %v59_v53, %v59_v53  ;;  %v95_v61 = vsel %vm94_vm1, %v59_v53, 0.0 }
  0x35   :  { %v68_v1 = vcombine.high %v66_v56, %v66_v56  ;;  %v175_v2 = vsel %vm94_vm1, %v153_v42, 0.0  ;;  %v98_v5 = vsel %vm94_vm1, %v66_v56, 0.0  ;;  %v239_v8 = vsel %vm94_vm1, %v217_v44, 0.0 }
  0x36   :  { %v170_v54 = vadd.f32 %v169_v43, %v168_v46  ;;  %v236_v3 = vadd.f32 %v235_v55, %v234_v58  ;;  %v96_v4 = vsel %vm94_vm1, %v67_v59, 0.0  ;;  %v83_v11 = vrot.slane %v69_v57, %v364_v6 }
  0x37   :  { %v97_v9 = vadd.f32 %v96_v4, %v95_v61  ;;  %v84_v12 = vcombine.high %v76_v60, %v76_v60  ;;  %v100_v13 = vsel %vm94_vm1, %v68_v1, 0.0  ;;  %v241_v15 = vsel %vm94_vm1, %v219_v63, 0.0 }
  0x38   :  { %v172_v62 = vadd.f32 %v171_v50, %v170_v54  ;;  %v238_v10 = vadd.f32 %v237_v0, %v236_v3  ;;  %v102_v18 = vsel %vm94_vm1, %v76_v60, 0.0  ;;  %v85_v21 = vcombine.high %v83_v11, %v83_v11 }
  0x39   :  { %v99_v16 = vadd.f32 %v98_v5, %v97_v9  ;;  %v104_v22 = vsel %vm94_vm1, %v84_v12, 0.0  ;;  %v106_v24 = vsel %vm94_vm1, %v83_v11, 0.0 }
  0x3a   :  { %v174_v7 = vadd.f32 %v173_v51, %v172_v62  ;;  %v240_v17 = vadd.f32 %v239_v8, %v238_v10  ;;  %v108_v25 = vsel %vm94_vm1, %v85_v21, 0.0 }
  0x3b   :  { %v101_v19 = vadd.f32 %v100_v13, %v99_v16 }
  0x3c   :  { %v176_v14 = vadd.f32 %v175_v2, %v174_v7  ;;  %v242_v20 = vadd.f32 %v241_v15, %v240_v17 }
  0x3d   :  { %v103_v23 = vadd.f32 %v102_v18, %v101_v19 }
  0x3e   :  { %177 = vadd.xlane.f32.xlu0 %v176_v14 }
  0x3f   :  { %v105_v6 = vadd.f32 %v104_v22, %v103_v23 }
  0x41   :  { %v107_v26 = vadd.f32 %v106_v24, %v105_v6 }
  0x42   :  { %243 = vadd.xlane.f32.xlu0 %v242_v20 }
  0x43   :  { %v109_v27 = vadd.f32 %v108_v25, %v107_v26 }
  0x45   :  { %110 = vadd.xlane.f32.xlu1 %v109_v27 }
  0xcb   :  { %v178_v29 = vpop.xlane.xlu0 %177 }
  0xcc   :  { %v179_v30 = vadd.f32 %v178_v29, %v115_v28 }
  0xce   :  { %180 = vst.msk [vmem:[#allocation3] sm:$0x3] %vm39_vm0, %v179_v30 }
  0xcf   :  { %v244_v32 = vpop.xlane.xlu0 %243 }
  0xd0   :  { %v245_v33 = vadd.f32 %v244_v32, %v181_v31 }
  0xd2   :  { %246 = vst.msk [vmem:[#allocation4] sm:$0x3] %vm39_vm0, %v245_v33  ;;  %v111_v35 = vpop.xlane.xlu1 %110 }
  0xd3   :  { %v112_v36 = vadd.f32 %v111_v35, %v47_v34 }
  0xd5   :  { %114 = vst.msk [vmem:[#allocation2] sm:$0x3] %vm39_vm0, %v112_v36  ;;  %v250_v37 = vld [vmem:[#allocation3] sm:$0x3] }
  0xd9   :  { %v251_v38 = vld [vmem:[#allocation4] sm:$0x3] }
  0xda   :  { %v252_v39 = vmul.f32 %v251_v38, %v250_v37 }
  0xdc   :  { %v253_v40 = vmax.f32 %v252_v39, 1e-16  ;;  %v254_v41 = vld [vmem:[#allocation2] sm:$0x3] }
  0xde   :  { %268 = vrsqrt.f32 %v253_v40 }
  0xe8   :  { %v269_v42 = vpop.eup %268 }
  0xe9   :  { %v256_v43 = vmul.f32 %v269_v42, %v254_v41 }
  0xeb   :  { %257 = vst.msk [vmem:[%s411_s2] sm:$0x3] %vm39_vm0, %v256_v43 }
  0xec   :  { %262 = vsyncpa [#allocation6], 1 }
  0xed   :  { %263 = vsyncpa [#allocation8], 1 }

</bundles_post_ra>
